<compile_context>
chip_gen: v5e
topology: v5e:2x2
jax: 0.10.0
libtpu: 0.0.40
codegen_flags: <defaults>
</compile_context>

<pallas_src>
import functools

import jax
import jax.numpy as jnp
from jax import lax
from jax.experimental import pallas as pl
from jax.experimental.pallas import tpu as pltpu


def _round_up(x, m):
    return (x + m - 1) // m * m


# -----------------------------------------------------------------------------
# Kernel 1: tiled matmul with folded conv-bias + BatchNorm (eval) epilogue
# -----------------------------------------------------------------------------
def _matmul_kernel(p_ref, w_ref, s_ref, o_ref):
    # Output block is f32 and resident across the K axis: initialize it with the
    # per-channel shift (bias + BN folded) on the first K step, then accumulate.
    @pl.when(pl.program_id(2) == 0)
    def _():
        o_ref[...] = jnp.broadcast_to(s_ref[...], o_ref.shape)

    o_ref[...] += jnp.dot(p_ref[...], w_ref[...],
                          preferred_element_type=jnp.float32)


def _fused_patch_matmul(patches, wmat, shift):
    """patches (M, K) bf16, wmat (K, N) bf16, shift (1, N) f32.

    K and N must already be lane-dense multiples of 128.  M is padded to the
    row-tile size here.  Returns (M, N) float32.
    """
    M, K = patches.shape
    N = wmat.shape[1]
    tm = 512 if M >= 512 else _round_up(M, 8)
    tn = 128
    # K tile: largest multiple-of-128 divisor of K that is <= 1024.
    tk = K
    if K > 1024:
        for cand in range(1024, 0, -128):
            if K % cand == 0:
                tk = cand
                break
    Mp = _round_up(M, tm)
    if Mp != M:
        patches = jnp.pad(patches, ((0, Mp - M), (0, 0)))

    out = pl.pallas_call(
        _matmul_kernel,
        out_shape=jax.ShapeDtypeStruct((Mp, N), jnp.float32),
        grid=(Mp // tm, N // tn, K // tk),
        in_specs=[
            pl.BlockSpec((tm, tk), lambda i, j, k: (i, k)),
            pl.BlockSpec((tk, tn), lambda i, j, k: (k, j)),
            pl.BlockSpec((1, tn), lambda i, j, k: (0, j)),
        ],
        out_specs=pl.BlockSpec((tm, tn), lambda i, j, k: (i, j)),
        compiler_params=pltpu.CompilerParams(
            dimension_semantics=("parallel", "parallel", "arbitrary"),
            vmem_limit_bytes=32 * 1024 * 1024),
    )(patches, wmat, shift)
    return out[:M]


# -----------------------------------------------------------------------------
# Kernel 2: PA block  --  x * sigmoid(depthwise_conv3x3(x) + b)
# -----------------------------------------------------------------------------
def _pa_kernel(y_ref, w_ref, b_ref, o_ref, pad_ref, *, Hp, Wp):
    Cp = y_ref.shape[-1]
    # Build a 1-pixel zero halo around the current image in VMEM scratch.
    # Only the border needs zeroing; the interior is overwritten every step.
    # (Zeroed every step so megacore sharding of the batch axis stays correct.)
    zrow = jnp.zeros((1, Wp + 2, Cp), jnp.float32)
    zcol = jnp.zeros((Hp + 2, 1, Cp), jnp.float32)
    pad_ref[pl.ds(0, 1), :, :] = zrow
    pad_ref[pl.ds(Hp + 1, 1), :, :] = zrow
    pad_ref[:, pl.ds(0, 1), :] = zcol
    pad_ref[:, pl.ds(Wp + 1, 1), :] = zcol
    pad_ref[pl.ds(1, Hp), pl.ds(1, Wp), :] = y_ref[0]

    w = w_ref[...]                          # (9, 1, 1, Cp) per-channel 3x3 taps
    # Depthwise 3x3: initialize accumulator with the first tap (no zero fill).
    acc = pad_ref[0:Hp, 0:Wp, :] * w[0]
    for kh in range(3):
        for kw in range(3):
            if kh == 0 and kw == 0:
                continue
            acc = acc + pad_ref[kh:kh + Hp, kw:kw + Wp, :] * w[kh * 3 + kw]
    gate = jax.nn.sigmoid(acc + b_ref[...])
    o_ref[0] = y_ref[0] * gate


def _pa_apply(y4, w9, bias):
    """y4 (B, Hp, Wp, Cp) f32 with Cp a multiple of 128; w9 (9,1,1,Cp); bias (1,1,Cp)."""
    B, Hp, Wp, Cp = y4.shape
    kernel = functools.partial(_pa_kernel, Hp=Hp, Wp=Wp)
    return pl.pallas_call(
        kernel,
        out_shape=jax.ShapeDtypeStruct((B, Hp, Wp, Cp), jnp.float32),
        grid=(B,),
        in_specs=[
            pl.BlockSpec((1, Hp, Wp, Cp), lambda b: (b, 0, 0, 0)),
            pl.BlockSpec((9, 1, 1, Cp), lambda b: (0, 0, 0, 0)),
            pl.BlockSpec((1, 1, Cp), lambda b: (0, 0, 0)),
        ],
        out_specs=pl.BlockSpec((1, Hp, Wp, Cp), lambda b: (b, 0, 0, 0)),
        scratch_shapes=[pltpu.VMEM((Hp + 2, Wp + 2, Cp), jnp.float32)],
        compiler_params=pltpu.CompilerParams(
            dimension_semantics=("parallel",),
            vmem_limit_bytes=32 * 1024 * 1024),
    )(y4, w9, bias)


# -----------------------------------------------------------------------------
# PatchEmbed forward
# -----------------------------------------------------------------------------
def patch_embed_forward(x, params, *, patch_size, with_pos, eps=1e-5):
    """x: (B, C, H, W) float32 (NCHW, same as PyTorch). Returns (tokens, (Hp, Wp))."""
    B, C, H, W = x.shape
    p = patch_size
    k = p + 1
    pad = p // 2
    Hp, Wp = H // p, W // p
    out_ch = params["conv_w"].shape[0]

    # ---- channels-last im2col: single concat, no k^2-stacked 6-D transpose ----
    xp = jnp.pad(x, ((0, 0), (0, 0), (pad, pad), (pad, pad)))
    xhwc = jnp.transpose(xp, (0, 2, 3, 1))                     # (B, H+2p', W+2p', C)
    taps = []
    for kh in range(k):
        for kw in range(k):
            taps.append(xhwc[:, kh:kh + (Hp - 1) * p + 1:p,
                             kw:kw + (Wp - 1) * p + 1:p, :])   # (B, Hp, Wp, C)
    patches = jnp.concatenate(taps, axis=-1).reshape(B * Hp * Wp, k * k * C)

    # ---- fold conv bias + BatchNorm (eval mode, running stats) into W / shift ----
    scale = params["bn_gamma"] * lax.rsqrt(params["bn_var"] + eps)           # (O,)
    shift = params["conv_b"] * scale + params["bn_beta"] - params["bn_mean"] * scale
    # OIHW -> (kh, kw, C, O) matches the (kh, kw, c) patch-feature order above.
    wmat = jnp.transpose(params["conv_w"], (2, 3, 1, 0)).reshape(k * k * C, out_ch)
    wmat = wmat * scale[None, :]

    # ---- pad K / N to lane-dense multiples of 128; bf16 MXU operands ----
    K = k * k * C
    Kp = _round_up(K, 128)
    Np = _round_up(out_ch, 128)
    patches = jnp.pad(patches, ((0, 0), (0, Kp - K))).astype(jnp.bfloat16)
    wmat = jnp.pad(wmat, ((0, Kp - K), (0, Np - out_ch))).astype(jnp.bfloat16)
    shift = jnp.pad(shift, (0, Np - out_ch)).reshape(1, Np).astype(jnp.float32)

    y = _fused_patch_matmul(patches, wmat, shift)              # (B*Hp*Wp, Np) f32

    if with_pos:
        y4 = y.reshape(B, Hp, Wp, Np)                          # channels-last, lane-dense
        w9 = jnp.transpose(params["pa_w"][:, 0], (1, 2, 0)).reshape(9, 1, 1, out_ch)
        w9 = jnp.pad(w9, ((0, 0), (0, 0), (0, 0), (0, Np - out_ch))).astype(jnp.float32)
        b9 = jnp.pad(params["pa_b"], (0, Np - out_ch)).reshape(1, 1, Np).astype(jnp.float32)
        y4 = _pa_apply(y4, w9, b9)
        tokens = y4[:, :, :, :out_ch].reshape(B, Hp * Wp, out_ch)
    else:
        tokens = y[:, :out_ch].reshape(B, Hp * Wp, out_ch)     # == flatten(2).transpose(1,2)
    return tokens, (Hp, Wp)


# -----------------------------------------------------------------------------
# Pure-JAX (XLA) reference for correctness checking
# -----------------------------------------------------------------------------
def patch_embed_reference(x, params, *, patch_size, with_pos, eps=1e-5):
    B, C, H, W = x.shape
    p = patch_size
    pad = p // 2
    out_ch = params["conv_w"].shape[0]
    y = lax.conv_general_dilated(
        x, params["conv_w"], (p, p), ((pad, pad), (pad, pad)),
        dimension_numbers=("NCHW", "OIHW", "NCHW"))
    y = y + params["conv_b"][None, :, None, None]
    scale = params["bn_gamma"] / jnp.sqrt(params["bn_var"] + eps)
    shift = params["bn_beta"] - params["bn_mean"] * scale
    y = y * scale[None, :, None, None] + shift[None, :, None, None]
    if with_pos:
        z = lax.conv_general_dilated(
            y, params["pa_w"], (1, 1), ((1, 1), (1, 1)),
            dimension_numbers=("NCHW", "OIHW", "NCHW"),
            feature_group_count=out_ch)
        z = z + params["pa_b"][None, :, None, None]
        y = y * jax.nn.sigmoid(z)
    tokens = jnp.transpose(y.reshape(B, out_ch, -1), (0, 2, 1))
    return tokens, (H // p, W // p)


# -----------------------------------------------------------------------------
# Main
# -----------------------------------------------------------------------------
if __name__ == "__main__":
    # Small, forward-consistent shapes.
    B, in_ch, H, W = 2, 4, 16, 16
    patch_size, out_ch = 4, 32
    k = patch_size + 1

    key = jax.random.PRNGKey(0)
    keys = jax.random.split(key, 9)
    params = {
        "conv_w": 0.1 * jax.random.normal(keys[0], (out_ch, in_ch, k, k), jnp.float32),
        "conv_b": 0.1 * jax.random.normal(keys[1], (out_ch,), jnp.float32),
        "bn_gamma": 1.0 + 0.1 * jax.random.normal(keys[2], (out_ch,), jnp.float32),
        "bn_beta": 0.1 * jax.random.normal(keys[3], (out_ch,), jnp.float32),
        "bn_mean": 0.1 * jax.random.normal(keys[4], (out_ch,), jnp.float32),
        "bn_var": 0.5 + jnp.abs(jax.random.normal(keys[5], (out_ch,), jnp.float32)),
        "pa_w": 0.1 * jax.random.normal(keys[6], (out_ch, 1, 3, 3), jnp.float32),
        "pa_b": 0.1 * jax.random.normal(keys[7], (out_ch,), jnp.float32),
    }
    x = jax.random.normal(keys[8], (B, in_ch, H, W), jnp.float32)

    for with_pos in (False, True):
        out, (hp, wp) = patch_embed_forward(
            x, params, patch_size=patch_size, with_pos=with_pos)
        out = jax.block_until_ready(out)
        ref, (hp_r, wp_r) = patch_embed_reference(
            x, params, patch_size=patch_size, with_pos=with_pos)
        assert out.shape == (B, (H // patch_size) * (W // patch_size), out_ch)
        assert (hp, wp) == (hp_r, wp_r) == (H // patch_size, W // patch_size)
        # bf16 MXU operands with f32 accumulation -> slightly looser tolerance.
        assert jnp.allclose(out, ref, rtol=2e-2, atol=2e-2), (
            f"mismatch (with_pos={with_pos}): "
            f"max abs err {float(jnp.max(jnp.abs(out - ref)))}")

    print("KERNEL_OK")
</pallas_src>

<mosaic_0001>
module attributes {stable_mosaic.version = 11 : i64} {
  func.func @_matmul_kernel(%arg0: i32, %arg1: i32, %arg2: i32, %arg3: memref<32x128xbf16, #tpu.memory_space<vmem>>, %arg4: memref<128x128xbf16, #tpu.memory_space<vmem>>, %arg5: memref<1x128xf32, #tpu.memory_space<vmem>>, %arg6: memref<32x128xf32, #tpu.memory_space<vmem>>) attributes {dimension_semantics = [#tpu.dimension_semantics<parallel>, #tpu.dimension_semantics<parallel>, #tpu.dimension_semantics<arbitrary>], iteration_bounds = array<i64: 1, 1, 1>, scalar_prefetch = 0 : i64, scratch_operands = 0 : i64, tpu.core_type = #tpu.core_type<tc>, window_params = [{transform_indices = @transform_0, window_bounds = array<i64: 32, 128>}, {transform_indices = @transform_1, window_bounds = array<i64: 128, 128>}, {transform_indices = @transform_2, window_bounds = array<i64: 1, 128>}, {transform_indices = @transform_3, window_bounds = array<i64: 32, 128>}]} {
    %c0_i32 = arith.constant 0 : i32
    %0 = arith.cmpi eq, %arg2, %c0_i32 : i32
    %1 = arith.extui %0 : i1 to i32
    %c0_i32_0 = arith.constant 0 : i32
    %2 = arith.cmpi ne, %1, %c0_i32_0 : i32
    scf.if %2 {
      %c0_8 = arith.constant 0 : index
      %c0_9 = arith.constant 0 : index
      %9 = vector.load %arg5[%c0_8, %c0_9] : memref<1x128xf32, #tpu.memory_space<vmem>>, vector<1x128xf32>
      %10 = vector.shape_cast %9 : vector<1x128xf32> to vector<1x128xf32>
      %11 = vector.broadcast %10 : vector<1x128xf32> to vector<32x128xf32>
      %c0_10 = arith.constant 0 : index
      %c0_11 = arith.constant 0 : index
      %12 = vector.load %arg6[%c0_10, %c0_11] : memref<32x128xf32, #tpu.memory_space<vmem>>, vector<32x128xf32>
      tpu.vector_store %arg6[%c0_10, %c0_11], %11 {strides = array<i32>} : memref<32x128xf32, #tpu.memory_space<vmem>>, vector<32x128xf32>,
    } else {
    }
    %c0 = arith.constant 0 : index
    %c0_1 = arith.constant 0 : index
    %3 = vector.load %arg6[%c0, %c0_1] : memref<32x128xf32, #tpu.memory_space<vmem>>, vector<32x128xf32>
    %c0_2 = arith.constant 0 : index
    %c0_3 = arith.constant 0 : index
    %4 = vector.load %arg3[%c0_2, %c0_3] : memref<32x128xbf16, #tpu.memory_space<vmem>>, vector<32x128xbf16>
    %c0_4 = arith.constant 0 : index
    %c0_5 = arith.constant 0 : index
    %5 = vector.load %arg4[%c0_4, %c0_5] : memref<128x128xbf16, #tpu.memory_space<vmem>>, vector<128x128xbf16>
    %cst = arith.constant dense<0.000000e+00> : vector<32x128xf32>
    %6 = tpu.matmul %4, %5, %cst {dimension_numbers = #tpu.dot_dimension_numbers<[1], [0], [0], [1], [0, 0, 1, 1], [], []>} : vector<32x128xbf16>, vector<128x128xbf16>, vector<32x128xf32> -> vector<32x128xf32>
    %7 = arith.addf %3, %6 : vector<32x128xf32>
    %c0_6 = arith.constant 0 : index
    %c0_7 = arith.constant 0 : index
    %8 = vector.load %arg6[%c0_6, %c0_7] : memref<32x128xf32, #tpu.memory_space<vmem>>, vector<32x128xf32>
    tpu.vector_store %arg6[%c0_6, %c0_7], %7 {strides = array<i32>} : memref<32x128xf32, #tpu.memory_space<vmem>>, vector<32x128xf32>,
    return
  }
  func.func @transform_0(%arg0: i32, %arg1: i32, %arg2: i32) -> (i32, i32) {
    %c0_i32 = arith.constant 0 : i32
    return %arg0, %arg2 : i32, i32
  }
  func.func @transform_1(%arg0: i32, %arg1: i32, %arg2: i32) -> (i32, i32) {
    %c0_i32 = arith.constant 0 : i32
    return %arg2, %arg1 : i32, i32
  }
  func.func @transform_2(%arg0: i32, %arg1: i32, %arg2: i32) -> (i32, i32) {
    %c0_i32 = arith.constant 0 : i32
    %c0_i32_0 = arith.constant 0 : i32
    return %c0_i32, %arg1 : i32, i32
  }
  func.func @transform_3(%arg0: i32, %arg1: i32, %arg2: i32) -> (i32, i32) {
    %c0_i32 = arith.constant 0 : i32
    return %arg0, %arg1 : i32, i32
  }
}

</mosaic_0001>

<bundles_post_ra>
// kernel: tpu_custom_call.1
= control target key start
LH: loop header
LB: loop body
LE: loop exit
PB: predicated region body
PF: predicated region fallthrough
CT: control target
= control target key end

     0   :  { %8 = vsyncpa [#allocation3], 0  ;;  %s373_s0 = inlined_call_operand.hbm [shape: bf16[32,128], index: 0, kind: input, shape index: {}]   ;;  %s374_s1 = inlined_call_operand.hbm [shape: bf16[128,128], index: 1, kind: input, shape index: {}]   ;;  %s375_s2 = inlined_call_operand.vmem [shape: f32[1,128], index: 2, kind: input, shape index: {}]   ;;  %s376_s3 = inlined_call_operand.hbm [shape: f32[32,128], index: 3, kind: output, shape index: {}]  }
   0x1   :  { %9 = vsyncpa [#allocation6], 0 }
   0x2   :  { %10 = vsyncpa [#allocation4], 0  ;;  %s15_s14 = sshll.u32 %s373_s0, 4  ;;  %s334_s15 = smov [#allocation2]   ;;  %s16_s14 = int_to_ptr.hbm [resolvable:$true] %s15_s14 }
   0x3   :  { %s17_s16 = sshll.u32 %s334_s15, 4  ;;  %s28_s19 = sshll.u32 %s374_s1, 4  ;;  %s18_s16 = int_to_ptr.vmem [resolvable:$true] %s17_s16  ;;  %s29_s19 = int_to_ptr.hbm [resolvable:$true] %s28_s19 }
   0x4   :  { %s335_s20 = smov 64   ;;  %s336_s21 = smov 4  }
   0x5   :  { %23 = dma.hbm_to_vmem [thread:$0]  %s16_s14, 256, %s18_s16, [#allocation3], %s335_s20, %s335_s20, %s336_s21  }
   0x6   :  { %s337_s22 = smov [#allocation5]  }
   0x7   :  { %s30_s23 = sshll.u32 %s337_s22, 4  ;;  %s31_s23 = int_to_ptr.vmem [resolvable:$true] %s30_s23 }
   0x8   :  { %36 = dma.hbm_to_vmem [thread:$0]  %s29_s19, 1024, %s31_s23, [#allocation6], %s335_s20, %s335_s20, %s336_s21  }
   0x9   :  { %328 = dma.done.wait [#allocation3], 256  }
   0xa   :  { %329 = vsyncadd [#allocation3], 4294967040 }
   0xb   :  { %330 = dma.done.wait [#allocation6], 1024  }
   0xc   :  { %331 = vsyncadd [#allocation6], 4294966272  ;;  %v239_v0 = vld [vmem:[#allocation5 + $0x38] sm:$0xff]  ;;  %v238_v1 = vld [vmem:[#allocation5 + $0x30] sm:$0xff]  ;;  %s338_s24 = smov [#allocation7]   ;;  %s176_s28 = sshll.u32 %s376_s3, 4  ;;  %s177_s28 = int_to_ptr.hbm [resolvable:$true] %s176_s28 }
   0xd   :  { %143 = vmatpush.bf16.msra.mxu0 %v239_v0  ;;  %240 = vmatpush.bf16.msra.mxu1 %v239_v0  ;;  %v237_v2 = vld [vmem:[#allocation5 + $0x28] sm:$0xff]  ;;  %v236_v3 = vld [vmem:[#allocation5 + $0x20] sm:$0xff]  ;;  %v235_v4 = vld [vmem:[#allocation5 + $0x18] sm:$0xff]  ;;  %s174_s25 = sshll.u32 %s338_s24, 4  ;;  %s340_s29 = smov 8   ;;  %s175_s25 = int_to_ptr.vmem [resolvable:$true] %s174_s25 }
   0xe   :  { %v234_v5 = vld [vmem:[#allocation5 + $0x10] sm:$0xff]  ;;  %v233_v6 = vld [vmem:[#allocation5 + $0x8] sm:$0xff]  ;;  %v232_v7 = vld [vmem:[#allocation5] sm:$0xff] }
   0xf   :  { %v230_v8 = vld [vmem:[#allocation2] sm:$0xff]  ;;  %v231_v9 = vld [vmem:[#allocation2 + $0x8] sm:$0xff] }
  0x10   :  { %v255_v10 = vld [vmem:[%s375_s2] ss:$0 sm:$0xff]  ;;  %s339_s2 = smov 128  }
  0x11   :  { %144 = vmatpush.bf16.msra.mxu0 %v238_v1  ;;  %241 = vmatpush.bf16.msra.mxu1 %v238_v1 }
  0x15   :  { %145 = vmatpush.bf16.msra.mxu0 %v237_v2  ;;  %242 = vmatpush.bf16.msra.mxu1 %v237_v2 }
  0x19   :  { %146 = vmatpush.bf16.msra.mxu0 %v236_v3  ;;  %243 = vmatpush.bf16.msra.mxu1 %v236_v3 }
  0x1d   :  { %147 = vmatpush.bf16.msra.mxu0 %v235_v4  ;;  %244 = vmatpush.bf16.msra.mxu1 %v235_v4 }
  0x21   :  { %148 = vmatpush.bf16.msra.mxu0 %v234_v5  ;;  %245 = vmatpush.bf16.msra.mxu1 %v234_v5 }
  0x25   :  { %149 = vmatpush.bf16.msra.mxu0 %v233_v6  ;;  %246 = vmatpush.bf16.msra.mxu1 %v233_v6 }
  0x29   :  { %150 = vmatpush.bf16.msra.mxu0 %v232_v7  ;;  %247 = vmatpush.bf16.msra.mxu1 %v232_v7 }
  0x2c   :  { %151 = vmatmul.bf16.vlgmr.msra.gmra.mxu0 %v230_v8  ;;  %156 = vmatmul.bf16.vlgmr.msra.gmra.mxu1 %v231_v9 }
  0xa9   :  { %v152_v11 = vpop.f32.mrf.mxu0  ;;  %v157_v12 = vpop.f32.mrf.mxu1 }
  0xaa   :  { %v162_v13 = vadd.f32 %v255_v10, %v152_v11  ;;  %v164_v14 = vadd.f32 %v255_v10, %v157_v12 }
  0xac   :  { %166 = vst [vmem:[#allocation7] sm:$0xff] %v162_v13 }
  0xad   :  { %168 = vst [vmem:[#allocation7 + $0x10] sm:$0xff] %v164_v14 }
  0xb1   :  { %v154_v15 = vpop.f32.mrf.mxu0  ;;  %v159_v16 = vpop.f32.mrf.mxu1 }
  0xb2   :  { %v163_v17 = vadd.f32 %v255_v10, %v154_v15  ;;  %v165_v18 = vadd.f32 %v255_v10, %v159_v16 }
  0xb4   :  { %167 = vst [vmem:[#allocation7 + $0x8] sm:$0xff] %v163_v17 }
  0xb5   :  { %169 = vst [vmem:[#allocation7 + $0x18] sm:$0xff] %v165_v18 }
  0xb6   :  { %182 = dma.vmem_to_hbm [thread:$0]  %s175_s25, 512, %s177_s28, [#allocation4], %s339_s2, %s339_s2, %s340_s29  }
  0xb7   :  { %332 = dma.done.wait [#allocation4], 512  }
  0xb8   :  { %333 = vsyncadd [#allocation4], 4294966784 }
  0xb9   :  { %187 = vsyncpa [#allocation3], 1 }
  0xba   :  { %188 = vsyncpa [#allocation6], 1 }
  0xbb   :  { %189 = vsyncpa [#allocation4], 1 }

</bundles_post_ra>
